<compile_context>
chip_gen: v7x
topology: tpu7x:2x2x1
jax: 0.10.0
libtpu: 0.0.40
codegen_flags: <defaults>
</compile_context>

<pallas_src>
import jax
import jax.numpy as jnp
from jax.experimental import pallas as pl
from jax.experimental.pallas import tpu as pltpu

LATENT_DIM = 5
HIDDEN_DIM = 15
OUTPUT_DIM = 2

IN_PAD = 8            # latent lanes padded 5 -> 8 (full-array last dim in BlockSpec)
HID_PAD = 128         # hidden padded 15 -> 128 (resident weights, cost is negligible)
OUT_PAD = 8           # output lanes padded 2 -> 8
BATCH_TILE = 1024     # rows per grid step (sweepable; clamped per call)
PALLAS_MIN_BATCH = 1024  # below this, plain XLA beats the kernel launch overhead


def generator_kernel(x_ref, w1_ref, b1_ref, w2_ref, b2_ref, o_ref):
    # One batch tile: (TB, 8) @ (8, 128) -> +b1, ReLU -> (TB,128) @ (128, 8) -> +b2.
    x = x_ref[...]                                                        # (TB, 8)
    h = jnp.dot(x, w1_ref[...], preferred_element_type=jnp.float32)      # (TB, 128) f32
    h = jnp.maximum(h + b1_ref[...], 0.0)                                 # bias + ReLU in f32
    y = jnp.dot(h.astype(w2_ref.dtype), w2_ref[...],
                preferred_element_type=jnp.float32)                       # (TB, 8) f32
    o_ref[...] = (y + b2_ref[...]).astype(o_ref.dtype)


def _round_up(n, m):
    return ((n + m - 1) // m) * m


def _pad2d(a, rows, cols):
    out = jnp.zeros((rows, cols), a.dtype)
    return out.at[: a.shape[0], : a.shape[1]].set(a)


def generator_forward_pallas(x, w1, b1, w2, b2, *, batch_tile=BATCH_TILE,
                             compute_dtype=jnp.bfloat16):
    """Narrow-lane, batch-tiled Pallas forward.

    x:  (B, LATENT_DIM) f32
    w1: (LATENT_DIM, HIDDEN_DIM), b1: (1, HIDDEN_DIM)
    w2: (HIDDEN_DIM, OUTPUT_DIM), b2: (1, OUTPUT_DIM)
    compute_dtype: streaming dtype for x/w1/w2 (accumulation always f32).
    """
    B = x.shape[0]

    # Clamp tile: multiple of 8 sublanes, and keep >= 2 grid steps when possible
    # so dimension_semantics=("parallel",) can split work across v7x's 2 TCs.
    bt = min(int(batch_tile), max(8, _round_up(B, 8) // 2))
    bt = max(8, (bt // 8) * 8)
    Bp = pl.cdiv(B, bt) * bt
    grid = (Bp // bt,)

    compute_dtype = jnp.dtype(compute_dtype)

    # Narrow padded layouts (zero-filled padding -> padded lanes contribute 0).
    xp = _pad2d(x.astype(compute_dtype), Bp, IN_PAD)            # (Bp, 8)
    w1p = _pad2d(w1.astype(compute_dtype), IN_PAD, HID_PAD)     # (8, 128)  resident
    w2p = _pad2d(w2.astype(compute_dtype), HID_PAD, OUT_PAD)    # (128, 8)  resident
    b1p = _pad2d(b1.astype(jnp.float32), 1, HID_PAD)            # (1, 128)  resident
    b2p = _pad2d(b2.astype(jnp.float32), 1, OUT_PAD)            # (1, 8)    resident

    # Honest DMA traffic: streamed x + streamed out + resident params (once).
    bytes_accessed = (
        Bp * IN_PAD * compute_dtype.itemsize          # x tiles read
        + Bp * OUT_PAD * 4                            # out tiles written (f32)
        + (IN_PAD * HID_PAD + HID_PAD * OUT_PAD) * compute_dtype.itemsize
        + (HID_PAD + OUT_PAD) * 4                     # biases (f32)
    )
    cost = pl.CostEstimate(
        flops=2 * B * (LATENT_DIM * HIDDEN_DIM + HIDDEN_DIM * OUTPUT_DIM),
        transcendentals=0,
        bytes_accessed=bytes_accessed,
    )

    out_padded = pl.pallas_call(
        generator_kernel,
        out_shape=jax.ShapeDtypeStruct((Bp, OUT_PAD), jnp.float32),
        grid=grid,
        in_specs=[
            pl.BlockSpec((bt, IN_PAD), lambda i: (i, 0)),        # x: streams over batch
            pl.BlockSpec((IN_PAD, HID_PAD), lambda i: (0, 0)),   # w1: resident
            pl.BlockSpec((1, HID_PAD), lambda i: (0, 0)),        # b1: resident
            pl.BlockSpec((HID_PAD, OUT_PAD), lambda i: (0, 0)),  # w2: resident
            pl.BlockSpec((1, OUT_PAD), lambda i: (0, 0)),        # b2: resident
        ],
        out_specs=pl.BlockSpec((bt, OUT_PAD), lambda i: (i, 0)),
        compiler_params=pltpu.CompilerParams(
            dimension_semantics=("parallel",),       # batch tiles shard across TCs on v7x
            vmem_limit_bytes=32 * 1024 * 1024,       # well under v7x's 64 MiB physical VMEM
        ),
        cost_estimate=cost,
    )(xp, w1p, b1p, w2p, b2p)

    # Strip batch padding and the 6 zero output lanes (cheap: (Bp, 8) source).
    return out_padded[:B, :OUTPUT_DIM]


def generator_forward(x, w1, b1, w2, b2, *, compute_dtype=jnp.bfloat16):
    """Dispatcher: plain XLA for small/latency batches, Pallas kernel otherwise."""
    if x.shape[0] < PALLAS_MIN_BATCH:
        return jnp.maximum(x @ w1 + b1, 0.0) @ w2 + b2
    return generator_forward_pallas(x, w1, b1, w2, b2, compute_dtype=compute_dtype)


def init_params(key):
    """Deterministic init mimicking nn.Linear's U(-1/sqrt(fan_in), 1/sqrt(fan_in))."""
    k1, k2, k3, k4 = jax.random.split(key, 4)
    lim1 = 1.0 / jnp.sqrt(LATENT_DIM)
    lim2 = 1.0 / jnp.sqrt(HIDDEN_DIM)
    # Stored transposed relative to PyTorch (which keeps (out, in)): here (in, out).
    w1 = jax.random.uniform(k1, (LATENT_DIM, HIDDEN_DIM), jnp.float32, -lim1, lim1)
    b1 = jax.random.uniform(k2, (1, HIDDEN_DIM), jnp.float32, -lim1, lim1)
    w2 = jax.random.uniform(k3, (HIDDEN_DIM, OUTPUT_DIM), jnp.float32, -lim2, lim2)
    b2 = jax.random.uniform(k4, (1, OUTPUT_DIM), jnp.float32, -lim2, lim2)
    return w1, b1, w2, b2


if __name__ == "__main__":
    key = jax.random.PRNGKey(0)
    kx, kp = jax.random.split(key)

    # Small demo batch; the tile auto-clamps to 128 rows so the grid has 2 steps.
    batch = 256
    x = jax.random.normal(kx, (batch, LATENT_DIM), jnp.float32)
    w1, b1, w2, b2 = init_params(kp)

    # Pure-JAX reference of the forward semantics.
    ref = jnp.maximum(x @ w1 + b1, 0.0) @ w2 + b2

    # Pallas kernel, f32 streaming path: bit-tight check.
    out_f32 = generator_forward_pallas(x, w1, b1, w2, b2, compute_dtype=jnp.float32)
    out_f32 = jax.block_until_ready(out_f32)
    assert out_f32.shape == (batch, OUTPUT_DIM)
    assert jnp.allclose(out_f32, ref, atol=1e-5, rtol=1e-5)

    # Pallas kernel, default bf16 streaming path: loose check (expected bf16 rounding).
    out_bf16 = generator_forward_pallas(x, w1, b1, w2, b2)  # compute_dtype=bf16
    out_bf16 = jax.block_until_ready(out_bf16)
    assert out_bf16.shape == (batch, OUTPUT_DIM)
    assert jnp.allclose(out_bf16, ref, atol=3e-2, rtol=3e-2)

    # Dispatcher latency path (no kernel) stays exact.
    small = generator_forward(x[:8], w1, b1, w2, b2)
    small = jax.block_until_ready(small)
    assert jnp.allclose(small, ref[:8], atol=1e-5, rtol=1e-5)

    print("KERNEL_OK")
</pallas_src>

<mosaic_0001>
module attributes {stable_mosaic.version = 11 : i64} {
  func.func @generator_kernel(%arg0: i32, %arg1: memref<128x8xf32, #tpu.memory_space<vmem>>, %arg2: memref<8x128xf32, #tpu.memory_space<vmem>>, %arg3: memref<1x128xf32, #tpu.memory_space<vmem>>, %arg4: memref<128x8xf32, #tpu.memory_space<vmem>>, %arg5: memref<1x8xf32, #tpu.memory_space<vmem>>, %arg6: memref<128x8xf32, #tpu.memory_space<vmem>>) attributes {dimension_semantics = [#tpu.dimension_semantics<parallel>], iteration_bounds = array<i64: 2>, scalar_prefetch = 0 : i64, scratch_operands = 0 : i64, tpu.core_type = #tpu.core_type<tc>, window_params = [{transform_indices = @transform_0, window_bounds = array<i64: 128, 8>}, {pipeline_mode = #tpu.pipeline_mode<synchronous>, transform_indices = @transform_1, window_bounds = array<i64: 8, 128>}, {pipeline_mode = #tpu.pipeline_mode<synchronous>, transform_indices = @transform_2, window_bounds = array<i64: 1, 128>}, {pipeline_mode = #tpu.pipeline_mode<synchronous>, transform_indices = @transform_3, window_bounds = array<i64: 128, 8>}, {pipeline_mode = #tpu.pipeline_mode<synchronous>, transform_indices = @transform_4, window_bounds = array<i64: 1, 8>}, {transform_indices = @transform_5, window_bounds = array<i64: 128, 8>}]} {
    %c0 = arith.constant 0 : index
    %c0_0 = arith.constant 0 : index
    %0 = vector.load %arg1[%c0, %c0_0] : memref<128x8xf32, #tpu.memory_space<vmem>>, vector<128x8xf32>
    %c0_1 = arith.constant 0 : index
    %c0_2 = arith.constant 0 : index
    %1 = vector.load %arg2[%c0_1, %c0_2] : memref<8x128xf32, #tpu.memory_space<vmem>>, vector<8x128xf32>
    %cst = arith.constant dense<0.000000e+00> : vector<128x128xf32>
    %2 = tpu.matmul %0, %1, %cst {dimension_numbers = #tpu.dot_dimension_numbers<[1], [0], [0], [1], [0, 0, 1, 1], [], []>} : vector<128x8xf32>, vector<8x128xf32>, vector<128x128xf32> -> vector<128x128xf32>
    %c0_3 = arith.constant 0 : index
    %c0_4 = arith.constant 0 : index
    %3 = vector.load %arg3[%c0_3, %c0_4] : memref<1x128xf32, #tpu.memory_space<vmem>>, vector<1x128xf32>
    %4 = vector.broadcast %3 : vector<1x128xf32> to vector<128x128xf32>
    %5 = arith.addf %2, %4 : vector<128x128xf32>
    %cst_5 = arith.constant 0.000000e+00 : f32
    %6 = vector.broadcast %cst_5 : f32 to vector<128x128xf32>
    %7 = arith.maximumf %5, %6 : vector<128x128xf32>
    %c0_6 = arith.constant 0 : index
    %c0_7 = arith.constant 0 : index
    %8 = vector.load %arg4[%c0_6, %c0_7] : memref<128x8xf32, #tpu.memory_space<vmem>>, vector<128x8xf32>
    %cst_8 = arith.constant dense<0.000000e+00> : vector<128x8xf32>
    %9 = tpu.matmul %7, %8, %cst_8 {dimension_numbers = #tpu.dot_dimension_numbers<[1], [0], [0], [1], [0, 0, 1, 1], [], []>} : vector<128x128xf32>, vector<128x8xf32>, vector<128x8xf32> -> vector<128x8xf32>
    %c0_9 = arith.constant 0 : index
    %c0_10 = arith.constant 0 : index
    %10 = vector.load %arg5[%c0_9, %c0_10] : memref<1x8xf32, #tpu.memory_space<vmem>>, vector<1x8xf32>
    %11 = vector.broadcast %10 : vector<1x8xf32> to vector<128x8xf32>
    %12 = arith.addf %9, %11 : vector<128x8xf32>
    %c0_11 = arith.constant 0 : index
    %c0_12 = arith.constant 0 : index
    %13 = vector.load %arg6[%c0_11, %c0_12] : memref<128x8xf32, #tpu.memory_space<vmem>>, vector<128x8xf32>
    tpu.vector_store %arg6[%c0_11, %c0_12], %12 {strides = array<i32>} : memref<128x8xf32, #tpu.memory_space<vmem>>, vector<128x8xf32>,
    return
  }
  func.func @transform_0(%arg0: i32) -> (i32, i32) {
    %c0_i32 = arith.constant 0 : i32
    %c0_i32_0 = arith.constant 0 : i32
    return %arg0, %c0_i32 : i32, i32
  }
  func.func @transform_1(%arg0: i32) -> (i32, i32) {
    %c0_i32 = arith.constant 0 : i32
    %c0_i32_0 = arith.constant 0 : i32
    %c0_i32_1 = arith.constant 0 : i32
    return %c0_i32, %c0_i32_0 : i32, i32
  }
  func.func @transform_2(%arg0: i32) -> (i32, i32) {
    %c0_i32 = arith.constant 0 : i32
    %c0_i32_0 = arith.constant 0 : i32
    %c0_i32_1 = arith.constant 0 : i32
    return %c0_i32, %c0_i32_0 : i32, i32
  }
  func.func @transform_3(%arg0: i32) -> (i32, i32) {
    %c0_i32 = arith.constant 0 : i32
    %c0_i32_0 = arith.constant 0 : i32
    %c0_i32_1 = arith.constant 0 : i32
    return %c0_i32, %c0_i32_0 : i32, i32
  }
  func.func @transform_4(%arg0: i32) -> (i32, i32) {
    %c0_i32 = arith.constant 0 : i32
    %c0_i32_0 = arith.constant 0 : i32
    %c0_i32_1 = arith.constant 0 : i32
    return %c0_i32, %c0_i32_0 : i32, i32
  }
  func.func @transform_5(%arg0: i32) -> (i32, i32) {
    %c0_i32 = arith.constant 0 : i32
    %c0_i32_0 = arith.constant 0 : i32
    return %arg0, %c0_i32 : i32, i32
  }
}

</mosaic_0001>

<bundles_post_ra>
// kernel: tpu_custom_call.1
= control target key start
LH: loop header
LB: loop body
LE: loop exit
PB: predicated region body
PF: predicated region fallthrough
CT: control target
= control target key end

     0   :  { %s956_s18 = smov 0   ;;  %s1105_s0 = inlined_call_operand.vmem [shape: f32[256,8], index: 0, kind: input, shape index: {}]   ;;  %s1106_s1 = inlined_call_operand.vmem [shape: f32[8,128], index: 1, kind: input, shape index: {}]   ;;  %s1107_s2 = inlined_call_operand.vmem [shape: f32[1,128], index: 2, kind: input, shape index: {}]   ;;  %s1108_s3 = inlined_call_operand.vmem [shape: f32[128,8], index: 3, kind: input, shape index: {}]   ;;  %s1109_s4 = inlined_call_operand.vmem [shape: f32[1,8], index: 4, kind: input, shape index: {}]   ;;  %s1110_s5 = inlined_call_operand.vmem [shape: f32[256,8], index: 5, kind: output, shape index: {}]  }
   0x1 LB: > { %s702_s19 = sadd.s32 4294967295, %s924_s18   ;;  %p706_p0 = scmp.ge.s32.totalorder %s924_s18, 1  ;;  %s924_s18 = sphi %s956_s18, %s15_s18  }
   0x2   : > { %p188_p1 = scmp.lt.s32.totalorder %s924_s18, 3 }
   0x4   : > { %p189_p2 = pnand %p706_p0, %p188_p1 }
   0x5   : > { %v244_v0 = vld [vmem:[%s1106_s1] sm:$0xff] (!%p189_p2)  ;;  %s707_s22 = sshll.u32 (!%p189_p2), %s702_s19, 4  ;;  %v463_v2 = vld [vmem:[%s1108_s3 + $0x8] sm:$0xff] (!%p189_p2)  ;;  %v464_v4 = vld [vmem:[%s1108_s3 + $0x10] sm:$0xff] (!%p189_p2)  ;;  %vm252_vm0 = vcmask (!%p189_p2), 64512  }
   0x6   : > { %192 = sbr.rel (%p189_p2) target bundleno = 480 (0x1e0), region = 40  ;;  %v462_v1 = vld [vmem:[%s1108_s3] sm:$0xff] (!%p189_p2)  ;;  %780 = vmatprep.subr.mxu0 (!%p189_p2), %v244_v0  ;;  %p217_p3 = scmp.lt.s32.totalorder (!%p189_p2), %s707_s22, 31  ;;  %v465_v5 = vld [vmem:[%s1108_s3 + $0x18] sm:$0xff] (!%p189_p2)  ;;  %v467_v8 = vld [vmem:[%s1108_s3 + $0x28] sm:$0xff] (!%p189_p2) }
   0x7   : > { %v862_v3 = vpack.c.bf16 (!%p189_p2), %v463_v2, %v462_v1  ;;  %781 = vmatpush3.msra.mxu0 (!%p189_p2), %v244_v0  ;;  %v866_v6 = vpack.c.bf16 (!%p189_p2), %v465_v5, %v464_v4  ;;  %v466_v7 = vld [vmem:[%s1108_s3 + $0x20] sm:$0xff] (!%p189_p2)  ;;  %v468_v13 = vld [vmem:[%s1108_s3 + $0x30] sm:$0xff] (!%p189_p2)  ;;  %v469_v14 = vld [vmem:[%s1108_s3 + $0x38] sm:$0xff] (!%p189_p2) }
   0x8   : > { %v870_v12 = vpack.c.bf16 (!%p189_p2), %v467_v8, %v466_v7  ;;  %v874_v17 = vpack.c.bf16 (!%p189_p2), %v469_v14, %v468_v13  ;;  %v470_v18 = vld [vmem:[%s1108_s3 + $0x40] sm:$0xff] (!%p189_p2)  ;;  %v471_v19 = vld [vmem:[%s1108_s3 + $0x48] sm:$0xff] (!%p189_p2)  ;;  %v472_v23 = vld [vmem:[%s1108_s3 + $0x50] sm:$0xff] (!%p189_p2) }
   0x9   : > { %863 = vmatprep.subr.bf16.mxu0 (!%p189_p2), %v862_v3  ;;  %894 = vmatprep.subr.bf16.mxu1 (!%p189_p2), %v862_v3  ;;  %v878_v22 = vpack.c.bf16 (!%p189_p2), %v471_v19, %v470_v18  ;;  %v473_v24 = vld [vmem:[%s1108_s3 + $0x58] sm:$0xff] (!%p189_p2)  ;;  %v474_v28 = vld [vmem:[%s1108_s3 + $0x60] sm:$0xff] (!%p189_p2)  ;;  %v475_v29 = vld [vmem:[%s1108_s3 + $0x68] sm:$0xff] (!%p189_p2) }
   0xa   : > { %902 = vmatpush3.bf16.msra.mxu1 (!%p189_p2), %v862_v3  ;;  %v882_v27 = vpack.c.bf16 (!%p189_p2), %v473_v24, %v472_v23  ;;  %v886_v32 = vpack.c.bf16 (!%p189_p2), %v475_v29, %v474_v28  ;;  %v476_v38 = vld [vmem:[%s1108_s3 + $0x70] sm:$0xff] (!%p189_p2)  ;;  %v477_v39 = vld [vmem:[%s1108_s3 + $0x78] sm:$0xff] (!%p189_p2)  ;;  %v711_v41 = vld [vmem:[%s1107_s2] ss:$0 sm:$0xff] (!%p189_p2) }
   0xb   : > { %895 = vmatprep.subr.bf16.mxu1 (!%p189_p2), %v866_v6  ;;  %v890_v40 = vpack.c.bf16 (!%p189_p2), %v477_v39, %v476_v38 }
   0xd   : > { %s1112_s22 = smov (!%p217_p3, %s707_s22), 31 }
   0xe   : > { %s708_s10 = sshll.u32 %s1112_s22, 3  ;;  %903 = vmatpush3.bf16.msra.mxu1 %v866_v6 }
   0xf   : > { %s993_s13 = scalar_lea.vmem %s1105_s0, %s708_s10  ;;  %896 = vmatprep.subr.bf16.mxu1 %v870_v12  ;;  %s1068_s19 = scalar_lea.vmem %s1110_s5, %s708_s10 }
  0x10   : > { %v228_v9 = vld [vmem:[%s993_s13] sm:$0xff]  ;;  %v229_v10 = vld [vmem:[%s993_s13 + $0x8] sm:$0xff]  ;;  %v230_v11 = vld [vmem:[%s993_s13 + $0x10] sm:$0xff] }
  0x11   : > { %782 = vmatprep.mubr.msk.f32.mxu0 %vm252_vm0, %v228_v9  ;;  %v231_v15 = vld [vmem:[%s993_s13 + $0x18] sm:$0xff]  ;;  %v232_v16 = vld [vmem:[%s993_s13 + $0x20] sm:$0xff]  ;;  %v233_v20 = vld [vmem:[%s993_s13 + $0x28] sm:$0xff] }
  0x12   : > { %783 = vmatmul.mubr.msk.f32.vlgmr.msra.gmra.mrb[0].mxu0 %vm252_vm0, %v229_v10  ;;  %904 = vmatpush3.bf16.msra.mxu1 %v870_v12  ;;  %v234_v21 = vld [vmem:[%s993_s13 + $0x30] sm:$0xff]  ;;  %v235_v25 = vld [vmem:[%s993_s13 + $0x38] sm:$0xff]  ;;  %v236_v26 = vld [vmem:[%s993_s13 + $0x40] sm:$0xff] }
  0x13   : > { %785 = vmatprep.mubr.msk.f32.mxu0 %vm252_vm0, %v230_v11  ;;  %865 = vmatpush3.bf16.msra.mxu0 %v862_v3  ;;  %v237_v30 = vld [vmem:[%s993_s13 + $0x48] sm:$0xff]  ;;  %v238_v31 = vld [vmem:[%s993_s13 + $0x50] sm:$0xff]  ;;  %v239_v33 = vld [vmem:[%s993_s13 + $0x58] sm:$0xff] }
  0x14   : > { %867 = vmatprep.subr.bf16.mxu0 %v866_v6  ;;  %897 = vmatprep.subr.bf16.mxu1 %v874_v17  ;;  %v240_v34 = vld [vmem:[%s993_s13 + $0x60] sm:$0xff]  ;;  %v241_v35 = vld [vmem:[%s993_s13 + $0x68] sm:$0xff]  ;;  %v242_v36 = vld [vmem:[%s993_s13 + $0x70] sm:$0xff] }
  0x15   : > { %v243_v37 = vld [vmem:[%s993_s13 + $0x78] sm:$0xff] }
  0x16   : > { %786 = vmatmul.mubr.msk.f32.gmra.mrb[2].mxu0 %vm252_vm0, %v231_v15  ;;  %905 = vmatpush3.bf16.msra.mxu1 %v874_v17 }
  0x17   : > { %788 = vmatprep.mubr.msk.f32.mxu0 %vm252_vm0, %v232_v16  ;;  %869 = vmatpush3.bf16.msra.mxu0 %v866_v6 }
  0x18   : > { %871 = vmatprep.subr.bf16.mxu0 %v870_v12  ;;  %898 = vmatprep.subr.bf16.mxu1 %v878_v22 }
  0x1a   : > { %789 = vmatmul.mubr.msk.f32.gmra.mrb[4].mxu0 %vm252_vm0, %v233_v20  ;;  %906 = vmatpush3.bf16.msra.mxu1 %v878_v22 }
  0x1b   : > { %791 = vmatprep.mubr.msk.f32.mxu0 %vm252_vm0, %v234_v21  ;;  %873 = vmatpush3.bf16.msra.mxu0 %v870_v12 }
  0x1c   : > { %875 = vmatprep.subr.bf16.mxu0 %v874_v17  ;;  %899 = vmatprep.subr.bf16.mxu1 %v882_v27 }
  0x1e   : > { %792 = vmatmul.mubr.msk.f32.gmra.mrb[6].mxu0 %vm252_vm0, %v235_v25  ;;  %907 = vmatpush3.bf16.msra.mxu1 %v882_v27 }
  0x1f   : > { %794 = vmatprep.mubr.msk.f32.mxu0 %vm252_vm0, %v236_v26  ;;  %877 = vmatpush3.bf16.msra.mxu0 %v874_v17  ;;  %v728_v26 = vld [vmem:[%s1109_s4] ss:$0 sm:$0xff] }
  0x20   : > { %879 = vmatprep.subr.bf16.mxu0 %v878_v22  ;;  %900 = vmatprep.subr.bf16.mxu1 %v886_v32 }
  0x22   : > { %795 = vmatmul.mubr.msk.f32.gmra.mrb[8].mxu0 %vm252_vm0, %v237_v30  ;;  %908 = vmatpush3.bf16.msra.mxu1 %v886_v32 }
  0x23   : > { %797 = vmatprep.mubr.msk.f32.mxu0 %vm252_vm0, %v238_v31  ;;  %881 = vmatpush3.bf16.msra.mxu0 %v878_v22 }
  0x24   : > { %883 = vmatprep.subr.bf16.mxu0 %v882_v27  ;;  %901 = vmatprep.subr.bf16.mxu1 %v890_v40 }
  0x26   : > { %798 = vmatmul.mubr.msk.f32.gmra.mrb[10].mxu0 %vm252_vm0, %v239_v33  ;;  %909 = vmatpush3.bf16.msra.mxu1 %v890_v40 }
  0x27   : > { %800 = vmatprep.mubr.msk.f32.mxu0 %vm252_vm0, %v240_v34  ;;  %885 = vmatpush3.bf16.msra.mxu0 %v882_v27 }
  0x28   : > { %887 = vmatprep.subr.bf16.mxu0 %v886_v32 }
  0x2a   : > { %801 = vmatmul.mubr.msk.f32.gmra.mrb[12].mxu0 %vm252_vm0, %v241_v35 }
  0x2b   : > { %803 = vmatprep.mubr.msk.f32.mxu0 %vm252_vm0, %v242_v36  ;;  %889 = vmatpush3.bf16.msra.mxu0 %v886_v32 }
  0x2c   : > { %891 = vmatprep.subr.bf16.mxu0 %v890_v40 }
  0x2e   : > { %804 = vmatmul.mubr.msk.f32.gmra.mrb[14].mxu0 %vm252_vm0, %v243_v37 }
  0x2f   : > { %893 = vmatpush3.bf16.msra.mxu0 %v890_v40 }
  0xe5   : > { %v784_v42 = vpop.f32.mrb[0].mxu0 }
  0xe6   : > { %v373_v43 = vadd.f32 %v784_v42, %v711_v41  ;;  %v367_v44 = vpop.f32.mrb[1].mxu0 }
  0xe7   : > { %v368_v45 = vadd.f32 %v711_v41, %v367_v44 }
  0xe8   : > { %v447_v48 = vmax.f32 %v373_v43, 0.0 }
  0xe9   : > { %v446_v46 = vmax.f32 %v368_v45, 0.0  ;;  %v787_v47 = vpop.f32.mrb[2].mxu0 }
  0xea   : > { %v383_v49 = vadd.f32 %v787_v47, %v711_v41  ;;  %v377_v50 = vpop.f32.mrb[3].mxu0 }
  0xeb   : > { %v378_v51 = vadd.f32 %v711_v41, %v377_v50  ;;  %838 = vmatprep.mubr.f32.mxu0 %v446_v46 }
  0xec   : > { %839 = vmatmul.mubr.f32.vlgmr.msra.gmra.mrb[16].mxu0 %v447_v48  ;;  %v449_v54 = vmax.f32 %v383_v49, 0.0 }
  0xed   : > { %v448_v52 = vmax.f32 %v378_v51, 0.0  ;;  %v790_v53 = vpop.f32.mrb[4].mxu0 }
  0xee   : > { %v393_v55 = vadd.f32 %v790_v53, %v711_v41  ;;  %v387_v56 = vpop.f32.mrb[5].mxu0 }
  0xef   : > { %v388_v57 = vadd.f32 %v711_v41, %v387_v56  ;;  %841 = vmatprep.mubr.f32.mxu0 %v448_v52 }
  0xf0   : > { %842 = vmatmul.mubr.f32.gmra.mrb[18].mxu0 %v449_v54  ;;  %v451_v60 = vmax.f32 %v393_v55, 0.0 }
  0xf1   : > { %v450_v58 = vmax.f32 %v388_v57, 0.0  ;;  %v793_v59 = vpop.f32.mrb[6].mxu0 }
  0xf2   : > { %v403_v61 = vadd.f32 %v793_v59, %v711_v41  ;;  %v397_v62 = vpop.f32.mrb[7].mxu0 }
  0xf3   : > { %844 = vmatprep.mubr.f32.mxu0 %v450_v58  ;;  %v398_v63 = vadd.f32 %v711_v41, %v397_v62 }
  0xf4   : > { %845 = vmatmul.mubr.f32.gmra.mrb[20].mxu0 %v451_v60  ;;  %v453_v2 = vmax.f32 %v403_v61, 0.0 }
  0xf5   : > { %v796_v0 = vpop.f32.mrb[8].mxu0  ;;  %v452_v1 = vmax.f32 %v398_v63, 0.0 }
  0xf6   : > { %v413_v3 = vadd.f32 %v796_v0, %v711_v41  ;;  %v407_v4 = vpop.f32.mrb[9].mxu0 }
  0xf7   : > { %v408_v5 = vadd.f32 %v711_v41, %v407_v4  ;;  %847 = vmatprep.mubr.f32.mxu1 %v452_v1 }
  0xf8   : > { %848 = vmatmul.mubr.f32.vlgmr.msra.gmra.mrb[0].mxu1 %v453_v2  ;;  %v455_v8 = vmax.f32 %v413_v3, 0.0 }
  0xf9   : > { %v454_v6 = vmax.f32 %v408_v5, 0.0  ;;  %v799_v7 = vpop.f32.mrb[10].mxu0 }
  0xfa   : > { %v423_v9 = vadd.f32 %v799_v7, %v711_v41  ;;  %v417_v10 = vpop.f32.mrb[11].mxu0 }
  0xfb   : > { %v418_v11 = vadd.f32 %v711_v41, %v417_v10  ;;  %850 = vmatprep.mubr.f32.mxu1 %v454_v6 }
  0xfc   : > { %851 = vmatmul.mubr.f32.gmra.mrb[2].mxu1 %v455_v8  ;;  %v457_v14 = vmax.f32 %v423_v9, 0.0 }
  0xfd   : > { %v456_v12 = vmax.f32 %v418_v11, 0.0  ;;  %v802_v13 = vpop.f32.mrb[12].mxu0 }
  0xfe   : > { %v433_v15 = vadd.f32 %v802_v13, %v711_v41  ;;  %v427_v16 = vpop.f32.mrb[13].mxu0 }
  0xff   : > { %v428_v17 = vadd.f32 %v711_v41, %v427_v16  ;;  %853 = vmatprep.mubr.f32.mxu1 %v456_v12 }
 0x100   : > { %854 = vmatmul.mubr.f32.gmra.mrb[4].mxu1 %v457_v14  ;;  %v459_v20 = vmax.f32 %v433_v15, 0.0 }
 0x101   : > { %v458_v18 = vmax.f32 %v428_v17, 0.0  ;;  %v805_v19 = vpop.f32.mrb[14].mxu0 }
 0x102   : > { %v443_v21 = vadd.f32 %v805_v19, %v711_v41  ;;  %v437_v22 = vpop.f32.mrb[15].mxu0 }
 0x103   : > { %v438_v23 = vadd.f32 %v711_v41, %v437_v22  ;;  %856 = vmatprep.mubr.f32.mxu1 %v458_v18 }
 0x104   : > { %857 = vmatmul.mubr.f32.gmra.mrb[6].mxu1 %v459_v20  ;;  %v461_v25 = vmax.f32 %v443_v21, 0.0 }
 0x105   : > { %v460_v24 = vmax.f32 %v438_v23, 0.0 }
 0x107   : > { %859 = vmatprep.mubr.f32.mxu1 %v460_v24 }
 0x108   : > { %860 = vmatmul.mubr.f32.gmra.mrb[8].mxu1 %v461_v25 }
 0x1bf   : > { %v840_v27 = vpop.f32.mrb[16].mxu0 }
 0x1c0   : > { %v557_v28 = vadd.f32 %v840_v27, %v728_v26  ;;  %v551_v29 = vpop.f32.mrb[17].mxu0 }
 0x1c1   : > { %v552_v30 = vadd.f32 %v728_v26, %v551_v29 }
 0x1c2   : > { %631 = vst.msk [vmem:[%s1068_s19 + $0x8] sm:$0xff] %vm252_vm0, %v557_v28 }
 0x1c3   : > { %630 = vst.msk [vmem:[%s1068_s19] sm:$0xff] %vm252_vm0, %v552_v30  ;;  %v843_v31 = vpop.f32.mrb[18].mxu0 }
 0x1c4   : > { %v567_v32 = vadd.f32 %v843_v31, %v728_v26  ;;  %v561_v33 = vpop.f32.mrb[19].mxu0 }
 0x1c5   : > { %v562_v34 = vadd.f32 %v728_v26, %v561_v33 }
 0x1c6   : > { %633 = vst.msk [vmem:[%s1068_s19 + $0x18] sm:$0xff] %vm252_vm0, %v567_v32 }
 0x1c7   : > { %632 = vst.msk [vmem:[%s1068_s19 + $0x10] sm:$0xff] %vm252_vm0, %v562_v34  ;;  %v846_v35 = vpop.f32.mrb[20].mxu0 }
 0x1c8   : > { %v577_v36 = vadd.f32 %v846_v35, %v728_v26  ;;  %v571_v37 = vpop.f32.mrb[21].mxu0 }
 0x1c9   : > { %v572_v38 = vadd.f32 %v728_v26, %v571_v37 }
 0x1ca   : > { %635 = vst.msk [vmem:[%s1068_s19 + $0x28] sm:$0xff] %vm252_vm0, %v577_v36 }
 0x1cb   : > { %634 = vst.msk [vmem:[%s1068_s19 + $0x20] sm:$0xff] %vm252_vm0, %v572_v38  ;;  %v849_v39 = vpop.f32.mrb[0].mxu1 }
 0x1cc   : > { %v587_v40 = vadd.f32 %v849_v39, %v728_v26  ;;  %v581_v41 = vpop.f32.mrb[1].mxu1 }
 0x1cd   : > { %v582_v42 = vadd.f32 %v728_v26, %v581_v41 }
 0x1ce   : > { %637 = vst.msk [vmem:[%s1068_s19 + $0x38] sm:$0xff] %vm252_vm0, %v587_v40 }
 0x1cf   : > { %636 = vst.msk [vmem:[%s1068_s19 + $0x30] sm:$0xff] %vm252_vm0, %v582_v42  ;;  %v852_v43 = vpop.f32.mrb[2].mxu1 }
 0x1d0   : > { %v597_v44 = vadd.f32 %v852_v43, %v728_v26  ;;  %v591_v45 = vpop.f32.mrb[3].mxu1 }
 0x1d1   : > { %v592_v46 = vadd.f32 %v728_v26, %v591_v45 }
 0x1d2   : > { %639 = vst.msk [vmem:[%s1068_s19 + $0x48] sm:$0xff] %vm252_vm0, %v597_v44 }
 0x1d3   : > { %638 = vst.msk [vmem:[%s1068_s19 + $0x40] sm:$0xff] %vm252_vm0, %v592_v46  ;;  %v855_v47 = vpop.f32.mrb[4].mxu1 }
 0x1d4   : > { %v607_v48 = vadd.f32 %v855_v47, %v728_v26  ;;  %v601_v49 = vpop.f32.mrb[5].mxu1 }
 0x1d5   : > { %v602_v50 = vadd.f32 %v728_v26, %v601_v49 }
 0x1d6   : > { %641 = vst.msk [vmem:[%s1068_s19 + $0x58] sm:$0xff] %vm252_vm0, %v607_v48 }
 0x1d7   : > { %640 = vst.msk [vmem:[%s1068_s19 + $0x50] sm:$0xff] %vm252_vm0, %v602_v50  ;;  %v858_v51 = vpop.f32.mrb[6].mxu1 }
 0x1d8   : > { %v617_v52 = vadd.f32 %v858_v51, %v728_v26  ;;  %v611_v53 = vpop.f32.mrb[7].mxu1 }
 0x1d9   : > { %v612_v54 = vadd.f32 %v728_v26, %v611_v53 }
 0x1da   : > { %643 = vst.msk [vmem:[%s1068_s19 + $0x68] sm:$0xff] %vm252_vm0, %v617_v52 }
 0x1db   : > { %642 = vst.msk [vmem:[%s1068_s19 + $0x60] sm:$0xff] %vm252_vm0, %v612_v54  ;;  %v861_v55 = vpop.f32.mrb[8].mxu1 }
 0x1dc   : > { %v627_v56 = vadd.f32 %v861_v55, %v728_v26  ;;  %v621_v57 = vpop.f32.mrb[9].mxu1 }
 0x1dd   : > { %v622_v58 = vadd.f32 %v728_v26, %v621_v57 }
 0x1de   : > { %645 = vst.msk [vmem:[%s1068_s19 + $0x78] sm:$0xff] %vm252_vm0, %v627_v56 }
 0x1df   : > { %644 = vst.msk [vmem:[%s1068_s19 + $0x70] sm:$0xff] %vm252_vm0, %v622_v58 }
 0x1e0 PF: > { %s15_s18 = sadd.s32 1, %s924_s18  }
 0x1e1   : > { %p12_p4 = scmp.ge.s32.totalorder %s15_s18, 4  }
 0x1e3   :  { %14 = sbr.rel (!%p12_p4) target bundleno = 1 (0x1), region = 70 }

</bundles_post_ra>
